<compile_context>
chip_gen: v7x
topology: tpu7x:2x2x1
jax: 0.10.0
libtpu: 0.0.40
codegen_flags: <defaults>
</compile_context>

<pallas_src>
import jax
import jax.numpy as jnp
from jax.experimental import pallas as pl
from jax.experimental.pallas import tpu as pltpu

_EPS = 1e-6  # matches torch.pairwise_distance default eps


def _make_triplet_kernel(margin, B, D, TB, Dp, use_mxu_reduce):
    """Build the kernel with all configuration baked in as trace-time constants."""
    margin = float(margin)

    def kernel(a_ref, p_ref, n_ref, o_ref):
        a = a_ref[...].astype(jnp.float32)
        p = p_ref[...].astype(jnp.float32)
        n = n_ref[...].astype(jnp.float32)

        # torch adds eps to the *difference* before the norm. Padded feature
        # columns (zero after the wrapper pad) must not receive eps.
        if Dp != D:
            col = jax.lax.broadcasted_iota(jnp.int32, (1, Dp), 1)
            eps = jnp.where(col < D, jnp.float32(_EPS), jnp.float32(0.0))
        else:
            eps = jnp.float32(_EPS)

        sq_pos = (a - p + eps) ** 2
        sq_neg = (a - n + eps) ** 2

        if use_mxu_reduce:
            # Per-row sum over the lane dim via the MXU (ones matmul): keeps the
            # XLU free on v7x. Precision.HIGHEST preserves f32 accuracy.
            ones = jnp.ones((Dp, 128), jnp.float32)
            pos_ss = jax.lax.dot(sq_pos, ones,
                                 precision=jax.lax.Precision.HIGHEST,
                                 preferred_element_type=jnp.float32)[:, 0:1]
            neg_ss = jax.lax.dot(sq_neg, ones,
                                 precision=jax.lax.Precision.HIGHEST,
                                 preferred_element_type=jnp.float32)[:, 0:1]
        else:
            pos_ss = jnp.sum(sq_pos, axis=-1, keepdims=True)
            neg_ss = jnp.sum(sq_neg, axis=-1, keepdims=True)

        hinge = jnp.maximum(jnp.sqrt(pos_ss) - jnp.sqrt(neg_ss) + margin, 0.0)

        # Mask rows that only exist because the last batch block is ragged.
        # Those rows read unspecified data; jnp.where drops NaN/Inf safely.
        if (B % TB) != 0:
            row = (jax.lax.broadcasted_iota(jnp.int32, (TB, 1), 0)
                   + pl.program_id(0) * TB)
            hinge = jnp.where(row < B, hinge, 0.0)

        # Lane-dense, (8,128)-aligned partial-sum store; wrapper reads [:, 0, 0].
        o_ref[...] = jnp.full((1, 8, 128), jnp.sum(hinge), dtype=jnp.float32)

    return kernel


def triplet_loss(anchor, positive, negative, margin=1.0,
                 block_rows=None, use_mxu_reduce=None):
    """Pallas TPU implementation of TripletLoss.forward (mean hinge loss)."""
    assert anchor.shape == positive.shape == negative.shape
    assert anchor.ndim == 2, "expected (batch, feature) inputs"
    B, D = anchor.shape
    itemsize = jnp.dtype(anchor.dtype).itemsize

    # ---- generation-gated tuning -------------------------------------------
    try:
        kind = jax.devices()[0].device_kind.lower()
    except Exception:
        kind = ""
    is_v7 = ("v7" in kind) or ("tpu7" in kind)
    is_v6 = "v6" in kind
    if is_v6:
        block_budget = 4 * 1024 * 1024   # per-input block bytes (~86% of roofline knee)
        vmem_limit = 64 * 1024 * 1024    # scoped default 32 MiB; physical 128 MiB
    else:
        # v5e (16 MiB scoped default -> override is load-bearing), v7x (64 MiB
        # physical VMEM), unknown: keep the double-buffered working set small.
        block_budget = 2 * 1024 * 1024
        vmem_limit = 32 * 1024 * 1024
    if use_mxu_reduce is None:
        use_mxu_reduce = is_v7           # neutral elsewhere, helps narrow-D v7x

    # ---- tiling -------------------------------------------------------------
    # Lane-dense feature dim (pad only when D is not already a multiple of 128).
    Dp = -(-D // 128) * 128
    # TODO(synk): for very large D (Dp > ~64K) add a second "arbitrary"
    # feature-dim grid axis with per-row partial-sum accumulators instead of a
    # single huge feature block.

    if block_rows is None:
        tb = block_budget // (Dp * itemsize)
        tb = max(8, (tb // 8) * 8)
    else:
        tb = max(8, (int(block_rows) // 8) * 8)
    TB = min(tb, -(-B // 8) * 8)
    if is_v7 and block_rows is None and B > 8:
        # Keep at least two batch tiles so the "parallel" axis spans both TCs.
        half = -(-((B + 1) // 2) // 8) * 8
        TB = min(TB, max(8, half))
    num_tiles = -(-B // TB)

    # Pipeline buffers (3 inputs x 2 buffers) + rough f32 temporaries estimate.
    ws = 6 * TB * Dp * itemsize + 4 * TB * Dp * 4
    if ws + (4 << 20) > vmem_limit:
        vmem_limit = min(ws + (4 << 20), 128 << 20)

    # ---- feature-dim pad only (no batch-dim copy) ---------------------------
    if Dp != D:
        pad = ((0, 0), (0, Dp - D))
        a = jnp.pad(anchor, pad)
        p = jnp.pad(positive, pad)
        n = jnp.pad(negative, pad)
    else:
        a, p, n = anchor, positive, negative

    kernel = _make_triplet_kernel(margin, B, D, TB, Dp, use_mxu_reduce)
    in_spec = pl.BlockSpec((TB, Dp), lambda i: (i, 0))

    partials = pl.pallas_call(
        kernel,
        out_shape=jax.ShapeDtypeStruct((num_tiles, 8, 128), jnp.float32),
        grid=(num_tiles,),
        in_specs=[in_spec, in_spec, in_spec],
        out_specs=pl.BlockSpec((1, 8, 128), lambda i: (i, 0, 0)),
        compiler_params=pltpu.CompilerParams(
            dimension_semantics=("parallel",),
            vmem_limit_bytes=int(vmem_limit),
        ),
    )(a, p, n)

    # Final reduction + mean in the wrapper (tiny XLA reduce over num_tiles scalars).
    return jnp.sum(partials[:, 0, 0]) / B


def _reference_triplet_loss(anchor, positive, negative, margin=1.0):
    a = anchor.astype(jnp.float32)
    p = positive.astype(jnp.float32)
    n = negative.astype(jnp.float32)
    dpos = jnp.sqrt(jnp.sum((a - p + _EPS) ** 2, axis=-1))
    dneg = jnp.sqrt(jnp.sum((a - n + _EPS) ** 2, axis=-1))
    return jnp.mean(jnp.maximum(dpos - dneg + margin, 0.0))


if __name__ == "__main__":
    key = jax.random.PRNGKey(0)

    # Case 1: small aligned shape (module's intended toy use).
    k1, k2, k3 = jax.random.split(key, 3)
    B, D = 8, 32
    anchor = jax.random.normal(k1, (B, D), dtype=jnp.float32)
    positive = jax.random.normal(k2, (B, D), dtype=jnp.float32)
    negative = jax.random.normal(k3, (B, D), dtype=jnp.float32)

    loss = triplet_loss(anchor, positive, negative, margin=1.0)
    jax.block_until_ready(loss)
    ref = _reference_triplet_loss(anchor, positive, negative, margin=1.0)
    assert jnp.allclose(loss, ref, rtol=1e-5, atol=1e-5), (loss, ref)

    # Case 2: unaligned B and D with a small forced tile -> multi-tile grid,
    # ragged last batch block (row mask), feature-column eps mask.
    k4, k5, k6 = jax.random.split(jax.random.PRNGKey(1), 3)
    B2, D2 = 37, 200
    a2 = jax.random.normal(k4, (B2, D2), dtype=jnp.float32)
    p2 = jax.random.normal(k5, (B2, D2), dtype=jnp.float32)
    n2 = jax.random.normal(k6, (B2, D2), dtype=jnp.float32)

    loss2 = triplet_loss(a2, p2, n2, margin=0.5, block_rows=16)
    jax.block_until_ready(loss2)
    ref2 = _reference_triplet_loss(a2, p2, n2, margin=0.5)
    assert jnp.allclose(loss2, ref2, rtol=1e-5, atol=1e-5), (loss2, ref2)

    # Case 3: exercise both reduction paths explicitly (XLU cross-lane sum vs
    # MXU ones-matmul) regardless of which TPU generation this runs on.
    loss3a = triplet_loss(a2, p2, n2, margin=0.5, block_rows=16,
                          use_mxu_reduce=True)
    loss3b = triplet_loss(a2, p2, n2, margin=0.5, block_rows=16,
                          use_mxu_reduce=False)
    jax.block_until_ready((loss3a, loss3b))
    assert jnp.allclose(loss3a, ref2, rtol=1e-5, atol=1e-5), (loss3a, ref2)
    assert jnp.allclose(loss3b, ref2, rtol=1e-5, atol=1e-5), (loss3b, ref2)

    print("KERNEL_OK")
</pallas_src>

<mosaic_0001>
module attributes {stable_mosaic.version = 11 : i64} {
  func.func @kernel(%arg0: i32, %arg1: memref<8x128xf32, #tpu.memory_space<vmem>>, %arg2: memref<8x128xf32, #tpu.memory_space<vmem>>, %arg3: memref<8x128xf32, #tpu.memory_space<vmem>>, %arg4: memref<1x8x128xf32, #tpu.memory_space<vmem>>) attributes {dimension_semantics = [#tpu.dimension_semantics<parallel>], iteration_bounds = array<i64: 1>, scalar_prefetch = 0 : i64, scratch_operands = 0 : i64, tpu.core_type = #tpu.core_type<tc>, window_params = [{transform_indices = @transform_0, window_bounds = array<i64: 8, 128>}, {transform_indices = @transform_1, window_bounds = array<i64: 8, 128>}, {transform_indices = @transform_2, window_bounds = array<i64: 8, 128>}, {transform_indices = @transform_3, window_bounds = array<i64: 1, 8, 128>}]} {
    %c0 = arith.constant 0 : index
    %c0_0 = arith.constant 0 : index
    %0 = vector.load %arg1[%c0, %c0_0] : memref<8x128xf32, #tpu.memory_space<vmem>>, vector<8x128xf32>
    %c0_1 = arith.constant 0 : index
    %c0_2 = arith.constant 0 : index
    %1 = vector.load %arg2[%c0_1, %c0_2] : memref<8x128xf32, #tpu.memory_space<vmem>>, vector<8x128xf32>
    %c0_3 = arith.constant 0 : index
    %c0_4 = arith.constant 0 : index
    %2 = vector.load %arg3[%c0_3, %c0_4] : memref<8x128xf32, #tpu.memory_space<vmem>>, vector<8x128xf32>
    %3 = tpu.iota {dimensions = array<i32: 1>} : vector<1x128xi32>
    %c32_i32 = arith.constant 32 : i32
    %4 = vector.broadcast %c32_i32 : i32 to vector<1x128xi32>
    %5 = arith.cmpi slt, %3, %4 : vector<1x128xi32>
    %cst = arith.constant 9.99999997E-7 : f32
    %cst_5 = arith.constant 0.000000e+00 : f32
    %6 = vector.broadcast %cst : f32 to vector<1x128xf32>
    %7 = vector.broadcast %cst_5 : f32 to vector<1x128xf32>
    %8 = arith.select %5, %6, %7 : vector<1x128xi1>, vector<1x128xf32>
    %9 = arith.subf %0, %1 : vector<8x128xf32>
    %10 = vector.broadcast %8 : vector<1x128xf32> to vector<8x128xf32>
    %11 = arith.addf %9, %10 : vector<8x128xf32>
    %12 = arith.mulf %11, %11 : vector<8x128xf32>
    %13 = arith.subf %0, %2 : vector<8x128xf32>
    %14 = vector.broadcast %8 : vector<1x128xf32> to vector<8x128xf32>
    %15 = arith.addf %13, %14 : vector<8x128xf32>
    %16 = arith.mulf %15, %15 : vector<8x128xf32>
    %cst_6 = arith.constant dense<0.000000e+00> : vector<8xf32>
    %17 = vector.multi_reduction <add>, %12, %cst_6 [1] : vector<8x128xf32> to vector<8xf32>
    %18 = vector.shape_cast %17 : vector<8xf32> to vector<8x1xf32>
    %cst_7 = arith.constant dense<0.000000e+00> : vector<8xf32>
    %19 = vector.multi_reduction <add>, %16, %cst_7 [1] : vector<8x128xf32> to vector<8xf32>
    %20 = vector.shape_cast %19 : vector<8xf32> to vector<8x1xf32>
    %21 = math.sqrt %18 : vector<8x1xf32>
    %22 = math.sqrt %20 : vector<8x1xf32>
    %23 = arith.subf %21, %22 : vector<8x1xf32>
    %cst_8 = arith.constant 1.000000e+00 : f32
    %24 = vector.broadcast %cst_8 : f32 to vector<8x1xf32>
    %25 = arith.addf %23, %24 : vector<8x1xf32>
    %cst_9 = arith.constant 0.000000e+00 : f32
    %26 = vector.broadcast %cst_9 : f32 to vector<8x1xf32>
    %27 = arith.maximumf %25, %26 : vector<8x1xf32>
    %28 = vector.shape_cast %27 : vector<8x1xf32> to vector<1x8x1xf32>
    %cst_10 = arith.constant dense<0.000000e+00> : vector<1xf32>
    %29 = vector.multi_reduction <add>, %28, %cst_10 [1, 2] : vector<1x8x1xf32> to vector<1xf32>
    %30 = vector.shape_cast %29 : vector<1xf32> to vector<1x1x1xf32>
    %31 = vector.extract %30[0, 0, 0] : f32 from vector<1x1x1xf32>
    %32 = vector.broadcast %31 : f32 to vector<1x8x128xf32>
    %c0_11 = arith.constant 0 : index
    %c0_12 = arith.constant 0 : index
    %c0_13 = arith.constant 0 : index
    %33 = vector.load %arg4[%c0_11, %c0_12, %c0_13] : memref<1x8x128xf32, #tpu.memory_space<vmem>>, vector<1x8x128xf32>
    tpu.vector_store %arg4[%c0_11, %c0_12, %c0_13], %32 {strides = array<i32>} : memref<1x8x128xf32, #tpu.memory_space<vmem>>, vector<1x8x128xf32>,
    return
  }
  func.func @transform_0(%arg0: i32) -> (i32, i32) {
    %c0_i32 = arith.constant 0 : i32
    %c0_i32_0 = arith.constant 0 : i32
    return %arg0, %c0_i32 : i32, i32
  }
  func.func @transform_1(%arg0: i32) -> (i32, i32) {
    %c0_i32 = arith.constant 0 : i32
    %c0_i32_0 = arith.constant 0 : i32
    return %arg0, %c0_i32 : i32, i32
  }
  func.func @transform_2(%arg0: i32) -> (i32, i32) {
    %c0_i32 = arith.constant 0 : i32
    %c0_i32_0 = arith.constant 0 : i32
    return %arg0, %c0_i32 : i32, i32
  }
  func.func @transform_3(%arg0: i32) -> (i32, i32, i32) {
    %c0_i32 = arith.constant 0 : i32
    %c0_i32_0 = arith.constant 0 : i32
    %c0_i32_1 = arith.constant 0 : i32
    return %arg0, %c0_i32, %c0_i32_0 : i32, i32, i32
  }
}

</mosaic_0001>

<bundles_post_ra>
// kernel: tpu_custom_call.1
= control target key start
LH: loop header
LB: loop body
LE: loop exit
PB: predicated region body
PF: predicated region fallthrough
CT: control target
= control target key end

     0   :  { %8 = vsyncpa [#allocation3], 0  ;;  %s291_s0 = inlined_call_operand.hbm [shape: f32[8,128], index: 0, kind: input, shape index: {}]   ;;  %s292_s1 = inlined_call_operand.hbm [shape: f32[8,128], index: 1, kind: input, shape index: {}]   ;;  %s293_s2 = inlined_call_operand.hbm [shape: f32[8,128], index: 2, kind: input, shape index: {}]   ;;  %s294_s3 = inlined_call_operand.hbm [shape: f32[1,8,128], index: 3, kind: output, shape index: {}]  }
   0x1   :  { %9 = vsyncpa [#allocation6], 0 }
   0x2   :  { %10 = vsyncpa [#allocation4], 0  ;;  %s218_s12 = smov [#allocation5]   ;;  %s219_s14 = smov [#allocation2]  }
   0x3   :  { %s27_s13 = sshll.u32 %s218_s12, 4  ;;  %s17_s15 = sshll.u32 %s219_s14, 4  ;;  %s28_s13 = int_to_ptr.vmem [resolvable:$true] %s27_s13  ;;  %s18_s15 = int_to_ptr.vmem [resolvable:$true] %s17_s15 }
   0x4   :  { %s124_s18 = scalar_lea.hbm %s292_s1, 128 }
   0x5   :  { %p125_p0 = scmp.ne.s32.totalorder %s292_s1, %s124_s18  ;;  %p128_p1 = scmp.lt.u32.totalorder %s124_s18, %s292_s1 }
   0x7   :  { %p130_p2 = pnand %p128_p1, %p125_p0 }
   0x9   :  { %133 = shalt.err (!%p130_p2)
}
   0xa   :  { %s134_s23 = scalar_lea.vmem %s28_s13, 128  ;;  %p139_p4 = scmp.lt.s32.totalorder %s28_s13, %s28_s13 }
   0xb   :  { %p135_p3 = scmp.ne.s32.totalorder %s28_s13, %s134_s23  ;;  %p140_p5 = scmp.lt.s32.totalorder %s134_s23, %s134_s23 }
   0xd   :  { %p141_p6 = por %p140_p5, %p139_p4 }
   0xf   :  { %p142_p7 = pnand %p141_p6, %p135_p3 }
  0x11   :  { %145 = shalt.err (!%p142_p7)
}
  0x12   :  { %30 = dma.hbm_to_vmem [thread:$0]  %s292_s1, 128, %s28_s13, [#allocation6]  }
  0x13   :  { %s146_s28 = scalar_lea.hbm %s291_s0, 128 }
  0x14   :  { %p147_p8 = scmp.ne.s32.totalorder %s291_s0, %s146_s28  ;;  %p150_p9 = scmp.lt.u32.totalorder %s146_s28, %s291_s0 }
  0x16   :  { %p152_p10 = pnand %p150_p9, %p147_p8 }
  0x18   :  { %155 = shalt.err (!%p152_p10)
}
  0x19   :  { %s156_s6 = scalar_lea.vmem %s18_s15, 128  ;;  %p161_p12 = scmp.lt.s32.totalorder %s18_s15, %s18_s15 }
  0x1a   :  { %p157_p11 = scmp.ne.s32.totalorder %s18_s15, %s156_s6  ;;  %p162_p13 = scmp.lt.s32.totalorder %s156_s6, %s156_s6 }
  0x1c   :  { %p163_p0 = por %p162_p13, %p161_p12 }
  0x1e   :  { %p164_p1 = pnand %p163_p0, %p157_p11 }
  0x20   :  { %167 = shalt.err (!%p164_p1)
}
  0x21   :  { %20 = dma.hbm_to_vmem [thread:$0]  %s291_s0, 128, %s18_s15, [#allocation3]  }
  0x22   :  { %s220_s8 = smov [#allocation7]   ;;  %s168_s12 = scalar_lea.hbm %s293_s2, 128 }
  0x23   :  { %s37_s9 = sshll.u32 %s220_s8, 4  ;;  %p169_p2 = scmp.ne.s32.totalorder %s293_s2, %s168_s12  ;;  %s38_s9 = int_to_ptr.vmem [resolvable:$true] %s37_s9 }
  0x24   :  { %p172_p3 = scmp.lt.u32.totalorder %s168_s12, %s293_s2 }
  0x26   :  { %p174_p4 = pnand %p172_p3, %p169_p2 }
  0x28   :  { %177 = shalt.err (!%p174_p4)
}
  0x29   :  { %s178_s18 = scalar_lea.vmem %s38_s9, 128  ;;  %p183_p6 = scmp.lt.s32.totalorder %s38_s9, %s38_s9 }
  0x2a   :  { %p179_p5 = scmp.ne.s32.totalorder %s38_s9, %s178_s18  ;;  %p184_p7 = scmp.lt.s32.totalorder %s178_s18, %s178_s18 }
  0x2c   :  { %p185_p8 = por %p184_p7, %p183_p6 }
  0x2e   :  { %p186_p9 = pnand %p185_p8, %p179_p5 }
  0x30   :  { %189 = shalt.err (!%p186_p9)
}
  0x31   :  { %40 = dma.hbm_to_vmem [thread:$0]  %s293_s2, 128, %s38_s9, [#allocation6]  }
  0x32   :  { %212 = dma.done.wait [#allocation3], 128  }
  0x33   :  { %213 = vsyncadd [#allocation3], 4294967168 }
  0x34   :  { %214 = dma.done.wait [#allocation6], 256  }
  0x35   :  { %215 = vsyncadd [#allocation6], 4294967040  ;;  %v53_v0 = vlaneseq  ;;  %v50_v2 = vld [vmem:[#allocation2] sm:$0xff]  ;;  %v51_v3 = vld [vmem:[#allocation5] sm:$0xff]  ;;  %v221_v4 = vmov 0.0   ;;  %vm84_vm5 = vcmask 7168  }
  0x36   :  { %v52_v6 = vld [vmem:[#allocation7] sm:$0xff]  ;;  %v57_v7 = vsub.f32 %v50_v2, %v51_v3  ;;  %s222_s2 = smov [#allocation8]  }
  0x37   :  { %v54_v1 = vand.u32 127, %v53_v0  ;;  %v60_v8 = vsub.f32 %v50_v2, %v52_v6  ;;  %s103_s19 = sshll.u32 %s222_s2, 4  ;;  %s104_s19 = int_to_ptr.vmem [resolvable:$true] %s103_s19 }
  0x38   :  { %s190_s21 = scalar_lea.vmem %s104_s19, 128  ;;  %p195_p11 = scmp.lt.s32.totalorder %s104_s19, %s104_s19 }
  0x39   :  { %vm55_vm0 = vcmp.lt.s32.totalorder %v54_v1, 32  ;;  %p191_p10 = scmp.ne.s32.totalorder %s104_s19, %s190_s21  ;;  %p196_p12 = scmp.lt.s32.totalorder %s190_s21, %s190_s21 }
  0x3a   :  { %v56_v5 = vsel %vm55_vm0, 1e-06, %v221_v4 }
  0x3b   :  { %v58_v9 = vadd.f32 %v57_v7, %v56_v5  ;;  %v61_v10 = vadd.f32 %v60_v8, %v56_v5  ;;  %p197_p13 = por %p196_p12, %p195_p11 }
  0x3d   :  { %v59_v11 = vmul.f32 %v58_v9, %v58_v9  ;;  %v62_v12 = vmul.f32 %v61_v10, %v61_v10  ;;  %p198_p0 = pnand %p197_p13, %p191_p10 }
  0x3f   :  { %63 = vadd.xlane.f32.xlu0 %v59_v11 }
  0x43   :  { %65 = vadd.xlane.f32.xlu0 %v62_v12 }
  0xcc   :  { %v64_v13 = vpop.xlane.xlu0 %63 }
  0xcd   :  { %120 = vrsqrt.f32 %v64_v13  ;;  %vm69_vm1 = vcmp.eq.f32.partialorder %v64_v13, inf  ;;  %v72_v20 = vand.u32 2147483648, %v64_v13  ;;  %vm71_vm3 = vcmp.eq.f32.partialorder %v64_v13, 0.0 }
  0xd0   :  { %v66_v14 = vpop.xlane.xlu0 %65 }
  0xd1   :  { %122 = vrsqrt.f32 %v66_v14  ;;  %vm76_vm2 = vcmp.eq.f32.partialorder %v66_v14, inf  ;;  %v79_v21 = vand.u32 2147483648, %v66_v14  ;;  %vm78_vm4 = vcmp.eq.f32.partialorder %v66_v14, 0.0 }
  0xd7   :  { %v121_v15 = vpop.eup %120 }
  0xd8   :  { %v68_v16 = vmul.f32 %v121_v15, %v64_v13 }
  0xda   :  { %v70_v19 = vsel %vm69_vm1, %v64_v13, %v68_v16 }
  0xdb   :  { %v123_v17 = vpop.eup %122  ;;  %v73_v23 = vsel %vm71_vm3, %v72_v20, %v70_v19 }
  0xdc   :  { %v75_v18 = vmul.f32 %v123_v17, %v66_v14 }
  0xde   :  { %v77_v22 = vsel %vm76_vm2, %v66_v14, %v75_v18 }
  0xdf   :  { %v80_v24 = vsel %vm78_vm4, %v79_v21, %v77_v22 }
  0xe0   :  { %v81_v25 = vsub.f32 %v73_v23, %v80_v24 }
  0xe2   :  { %v82_v26 = vadd.f32 1.0, %v81_v25 }
  0xe4   :  { %v83_v27 = vmax.f32 %v82_v26, 0.0 }
  0xe6   :  { %v85_v28 = vsel %vm84_vm5, %v83_v27, 0.0 }
  0xe7   :  { %86 = vadd.xlane.f32.xlu1 %v85_v28 }
 0x174   :  { %v87_v29 = vpop.xlane.xlu1 %86 }
 0x175   :  { %v88_v30 = vrot.slane %v87_v29, 4 }
 0x177   :  { %v89_v31 = vadd.f32 %v88_v30, %v87_v29 }
 0x179   :  { %v90_v32 = vrot.slane %v89_v31, 2 }
 0x17b   :  { %v91_v33 = vadd.f32 %v90_v32, %v89_v31 }
 0x17d   :  { %v92_v34 = vrot.slane %v91_v33, 1 }
 0x17f   :  { %v93_v35 = vadd.f32 %v92_v34, %v91_v33 }
 0x181   :  { %113 = vpush %v93_v35 }
 0x1b2   :  { %s114_s20 = spop %113 }
 0x1b3   :  { %v95_v36 = vstv %s114_s20 }
 0x1b4   :  { %96 = vst [vmem:[#allocation8] sm:$0xff] %v95_v36 }
 0x1b5   :  { %201 = shalt.err (!%p198_p0)
}
 0x1b6   :  { %s202_s24 = scalar_lea.hbm %s294_s3, 128 }
 0x1b7   :  { %p203_p1 = scmp.ne.s32.totalorder %s294_s3, %s202_s24  ;;  %p206_p2 = scmp.lt.u32.totalorder %s202_s24, %s294_s3 }
 0x1b9   :  { %p208_p3 = pnand %p206_p2, %p203_p1 }
 0x1bb   :  { %211 = shalt.err (!%p208_p3)
}
 0x1bc   :  { %106 = dma.vmem_to_hbm [thread:$0]  %s104_s19, 128, %s294_s3, [#allocation4]  }
 0x1bd   :  { %216 = dma.done.wait [#allocation4], 128  }
 0x1be   :  { %217 = vsyncadd [#allocation4], 4294967168 }
 0x1bf   :  { %110 = vsyncpa [#allocation3], 1 }
 0x1c0   :  { %111 = vsyncpa [#allocation6], 1 }
 0x1c1   :  { %112 = vsyncpa [#allocation4], 1 }

</bundles_post_ra>
